<compile_context>
chip_gen: v6e
topology: v6e:2x2x1
jax: 0.10.0
libtpu: 0.0.40
codegen_flags: <defaults>
</compile_context>

<pallas_src>
import jax
import jax.numpy as jnp
from jax.experimental import pallas as pl
from jax.experimental.pallas import tpu as pltpu

LANE = 128      # lane width / channel alignment
_TM = 256       # rows (B*H*W pixels) per grid step


def _mlp_kernel(x_ref, w1_ref, b1_ref, w2_ref, b2_ref, o_ref):
    # Linear 1 (1x1 conv): (TM, Cin_p) @ (Cin_p, Hid_p) on the MXU, fp32 acc.
    h = jnp.dot(x_ref[...], w1_ref[...], preferred_element_type=jnp.float32)
    h = h + b1_ref[...]

    # Exact (erf-based) GELU in fp32 — matches F.gelu default (approximate='none').
    h = 0.5 * h * (1.0 + jax.lax.erf(h * 0.7071067811865475))

    # Linear 2 (1x1 conv): (TM, Hid_p) @ (Hid_p, Cout_p).
    y = jnp.dot(h, w2_ref[...], preferred_element_type=jnp.float32)
    o_ref[...] = (y + b2_ref[...]).astype(o_ref.dtype)


def _round_up(n, m):
    return ((n + m - 1) // m) * m


def mlp_forward(x_nchw, w1, b1, w2, b2, *, tm=_TM):
    """1x1-conv MLP forward.

    x_nchw: (B, Cin, H, W)
    w1: (Cin, Hid)   == conv1.weight[:, :, 0, 0].T ;  b1: (Hid,)  == conv1.bias
    w2: (Hid, Cout)  == conv2.weight[:, :, 0, 0].T ;  b2: (Cout,) == conv2.bias
    returns (B, Cout, H, W)
    """
    B, Cin, Hs, Ws = x_nchw.shape
    Hid = w1.shape[1]
    Cout = w2.shape[1]
    dtype = x_nchw.dtype

    # 1x1 conv == per-pixel linear: channels-last, flatten pixels to rows.
    x2d = jnp.transpose(x_nchw, (0, 2, 3, 1)).reshape(-1, Cin)
    M = x2d.shape[0]

    # Lane/sublane alignment: channels -> multiples of 128, rows -> multiple of
    # the row tile (and >= 8). Zero padding is exact (see header comment).
    Cin_p = _round_up(Cin, LANE)
    Hid_p = _round_up(Hid, LANE)
    Cout_p = _round_up(Cout, LANE)
    tm = min(tm, _round_up(M, 8))
    Mp = _round_up(M, tm)

    x_p = jnp.zeros((Mp, Cin_p), dtype).at[:M, :Cin].set(x2d)
    w1_p = jnp.zeros((Cin_p, Hid_p), dtype).at[:Cin, :Hid].set(w1)
    b1_p = jnp.zeros((1, Hid_p), dtype).at[0, :Hid].set(b1)
    w2_p = jnp.zeros((Hid_p, Cout_p), dtype).at[:Hid, :Cout].set(w2)
    b2_p = jnp.zeros((1, Cout_p), dtype).at[0, :Cout].set(b2)

    out_p = pl.pallas_call(
        _mlp_kernel,
        out_shape=jax.ShapeDtypeStruct((Mp, Cout_p), dtype),
        grid=(Mp // tm,),
        in_specs=[
            # Activations: tiled over the pixel axis -> pipelined DMA.
            pl.BlockSpec((tm, Cin_p), lambda i: (i, 0)),
            # Weights / biases: constant index_map -> stay VMEM-resident.
            pl.BlockSpec((Cin_p, Hid_p), lambda i: (0, 0)),
            pl.BlockSpec((1, Hid_p), lambda i: (0, 0)),
            pl.BlockSpec((Hid_p, Cout_p), lambda i: (0, 0)),
            pl.BlockSpec((1, Cout_p), lambda i: (0, 0)),
        ],
        out_specs=pl.BlockSpec((tm, Cout_p), lambda i: (i, 0)),
        compiler_params=pltpu.CompilerParams(
            dimension_semantics=("parallel",),
        ),
    )(x_p, w1_p, b1_p, w2_p, b2_p)

    # TODO(synk): for very large Hid on v7x (64 MiB VMEM), add a K-tiled inner
    # loop over Hid instead of holding both full weight blocks resident.

    y2d = out_p[:M, :Cout]
    return jnp.transpose(y2d.reshape(B, Hs, Ws, Cout), (0, 3, 1, 2))


def _reference(x_nchw, w1, b1, w2, b2):
    h = jnp.einsum("bchw,cd->bdhw", x_nchw, w1) + b1[None, :, None, None]
    h = jax.nn.gelu(h, approximate=False)
    return jnp.einsum("bchw,cd->bdhw", h, w2) + b2[None, :, None, None]


if __name__ == "__main__":
    # Small shapes consistent with the module: x is (batch, in_ch, H, W).
    batch, in_ch, hidden_ch, out_ch, spatial = 2, 4, 32, 4, 16

    key = jax.random.PRNGKey(0)
    kx, k1, k2, k3, k4 = jax.random.split(key, 5)

    x = jax.random.normal(kx, (batch, in_ch, spatial, spatial), dtype=jnp.float32)

    # Deterministic synthetic parameters, pre-transposed to (in, out) layout.
    w1 = jax.random.normal(k1, (in_ch, hidden_ch), dtype=jnp.float32) * 0.1
    b1 = jax.random.normal(k2, (hidden_ch,), dtype=jnp.float32) * 0.1
    w2 = jax.random.normal(k3, (hidden_ch, out_ch), dtype=jnp.float32) * 0.1
    b2 = jax.random.normal(k4, (out_ch,), dtype=jnp.float32) * 0.1

    y = mlp_forward(x, w1, b1, w2, b2)
    jax.block_until_ready(y)

    y_ref = _reference(x, w1, b1, w2, b2)
    assert y.shape == (batch, out_ch, spatial, spatial)
    assert jnp.allclose(y, y_ref, atol=1e-4, rtol=1e-4), "mismatch vs reference"

    print("KERNEL_OK")
</pallas_src>

<mosaic_0001>
module attributes {stable_mosaic.version = 11 : i64} {
  func.func @_mlp_kernel(%arg0: i32, %arg1: memref<256x128xf32, #tpu.memory_space<vmem>>, %arg2: memref<128x128xf32, #tpu.memory_space<vmem>>, %arg3: memref<1x128xf32, #tpu.memory_space<vmem>>, %arg4: memref<128x128xf32, #tpu.memory_space<vmem>>, %arg5: memref<1x128xf32, #tpu.memory_space<vmem>>, %arg6: memref<256x128xf32, #tpu.memory_space<vmem>>) attributes {dimension_semantics = [#tpu.dimension_semantics<parallel>], iteration_bounds = array<i64: 2>, scalar_prefetch = 0 : i64, scratch_operands = 0 : i64, tpu.core_type = #tpu.core_type<tc>, window_params = [{transform_indices = @transform_0, window_bounds = array<i64: 256, 128>}, {pipeline_mode = #tpu.pipeline_mode<synchronous>, transform_indices = @transform_1, window_bounds = array<i64: 128, 128>}, {pipeline_mode = #tpu.pipeline_mode<synchronous>, transform_indices = @transform_2, window_bounds = array<i64: 1, 128>}, {pipeline_mode = #tpu.pipeline_mode<synchronous>, transform_indices = @transform_3, window_bounds = array<i64: 128, 128>}, {pipeline_mode = #tpu.pipeline_mode<synchronous>, transform_indices = @transform_4, window_bounds = array<i64: 1, 128>}, {transform_indices = @transform_5, window_bounds = array<i64: 256, 128>}]} {
    %c0 = arith.constant 0 : index
    %c0_0 = arith.constant 0 : index
    %0 = vector.load %arg1[%c0, %c0_0] : memref<256x128xf32, #tpu.memory_space<vmem>>, vector<256x128xf32>
    %c0_1 = arith.constant 0 : index
    %c0_2 = arith.constant 0 : index
    %1 = vector.load %arg2[%c0_1, %c0_2] : memref<128x128xf32, #tpu.memory_space<vmem>>, vector<128x128xf32>
    %cst = arith.constant dense<0.000000e+00> : vector<256x128xf32>
    %2 = tpu.matmul %0, %1, %cst {dimension_numbers = #tpu.dot_dimension_numbers<[1], [0], [0], [1], [0, 0, 1, 1], [], []>} : vector<256x128xf32>, vector<128x128xf32>, vector<256x128xf32> -> vector<256x128xf32>
    %c0_3 = arith.constant 0 : index
    %c0_4 = arith.constant 0 : index
    %3 = vector.load %arg3[%c0_3, %c0_4] : memref<1x128xf32, #tpu.memory_space<vmem>>, vector<1x128xf32>
    %4 = vector.broadcast %3 : vector<1x128xf32> to vector<256x128xf32>
    %5 = arith.addf %2, %4 : vector<256x128xf32>
    %cst_5 = arith.constant 5.000000e-01 : f32
    %6 = vector.broadcast %cst_5 : f32 to vector<256x128xf32>
    %7 = arith.mulf %6, %5 : vector<256x128xf32>
    %cst_6 = arith.constant 0.707106769 : f32
    %8 = vector.broadcast %cst_6 : f32 to vector<256x128xf32>
    %9 = arith.mulf %5, %8 : vector<256x128xf32>
    %10 = math.erf %9 : vector<256x128xf32>
    %cst_7 = arith.constant 1.000000e+00 : f32
    %11 = vector.broadcast %cst_7 : f32 to vector<256x128xf32>
    %12 = arith.addf %11, %10 : vector<256x128xf32>
    %13 = arith.mulf %7, %12 : vector<256x128xf32>
    %c0_8 = arith.constant 0 : index
    %c0_9 = arith.constant 0 : index
    %14 = vector.load %arg4[%c0_8, %c0_9] : memref<128x128xf32, #tpu.memory_space<vmem>>, vector<128x128xf32>
    %cst_10 = arith.constant dense<0.000000e+00> : vector<256x128xf32>
    %15 = tpu.matmul %13, %14, %cst_10 {dimension_numbers = #tpu.dot_dimension_numbers<[1], [0], [0], [1], [0, 0, 1, 1], [], []>} : vector<256x128xf32>, vector<128x128xf32>, vector<256x128xf32> -> vector<256x128xf32>
    %c0_11 = arith.constant 0 : index
    %c0_12 = arith.constant 0 : index
    %16 = vector.load %arg5[%c0_11, %c0_12] : memref<1x128xf32, #tpu.memory_space<vmem>>, vector<1x128xf32>
    %17 = vector.broadcast %16 : vector<1x128xf32> to vector<256x128xf32>
    %18 = arith.addf %15, %17 : vector<256x128xf32>
    %c0_13 = arith.constant 0 : index
    %c0_14 = arith.constant 0 : index
    %19 = vector.load %arg6[%c0_13, %c0_14] : memref<256x128xf32, #tpu.memory_space<vmem>>, vector<256x128xf32>
    tpu.vector_store %arg6[%c0_13, %c0_14], %18 {strides = array<i32>} : memref<256x128xf32, #tpu.memory_space<vmem>>, vector<256x128xf32>,
    return
  }
  func.func @transform_0(%arg0: i32) -> (i32, i32) {
    %c0_i32 = arith.constant 0 : i32
    %c0_i32_0 = arith.constant 0 : i32
    return %arg0, %c0_i32 : i32, i32
  }
  func.func @transform_1(%arg0: i32) -> (i32, i32) {
    %c0_i32 = arith.constant 0 : i32
    %c0_i32_0 = arith.constant 0 : i32
    %c0_i32_1 = arith.constant 0 : i32
    return %c0_i32, %c0_i32_0 : i32, i32
  }
  func.func @transform_2(%arg0: i32) -> (i32, i32) {
    %c0_i32 = arith.constant 0 : i32
    %c0_i32_0 = arith.constant 0 : i32
    %c0_i32_1 = arith.constant 0 : i32
    return %c0_i32, %c0_i32_0 : i32, i32
  }
  func.func @transform_3(%arg0: i32) -> (i32, i32) {
    %c0_i32 = arith.constant 0 : i32
    %c0_i32_0 = arith.constant 0 : i32
    %c0_i32_1 = arith.constant 0 : i32
    return %c0_i32, %c0_i32_0 : i32, i32
  }
  func.func @transform_4(%arg0: i32) -> (i32, i32) {
    %c0_i32 = arith.constant 0 : i32
    %c0_i32_0 = arith.constant 0 : i32
    %c0_i32_1 = arith.constant 0 : i32
    return %c0_i32, %c0_i32_0 : i32, i32
  }
  func.func @transform_5(%arg0: i32) -> (i32, i32) {
    %c0_i32 = arith.constant 0 : i32
    %c0_i32_0 = arith.constant 0 : i32
    return %arg0, %c0_i32 : i32, i32
  }
}

</mosaic_0001>

<bundles_post_ra>
// kernel: tpu_custom_call.1
= control target key start
LH: loop header
LB: loop body
LE: loop exit
PB: predicated region body
PF: predicated region fallthrough
CT: control target
= control target key end

     0   :  { %10 = vsyncpa [#allocation3], 0  ;;  %s2133_s0 = inlined_call_operand.hbm [shape: f32[512,128], index: 0, kind: input, shape index: {}]   ;;  %s2134_s1 = inlined_call_operand.hbm [shape: f32[128,128], index: 1, kind: input, shape index: {}]   ;;  %s2135_s2 = inlined_call_operand.vmem [shape: f32[1,128], index: 2, kind: input, shape index: {}]   ;;  %s2136_s3 = inlined_call_operand.hbm [shape: f32[128,128], index: 3, kind: input, shape index: {}]   ;;  %s2137_s4 = inlined_call_operand.vmem [shape: f32[1,128], index: 4, kind: input, shape index: {}]   ;;  %s2138_s5 = inlined_call_operand.hbm [shape: f32[512,128], index: 5, kind: output, shape index: {}]  }
   0x1   :  { %12 = vsyncpa [#allocation3 + $0x1], 0 }
   0x2   :  { %13 = vsyncpa [#allocation6], 0 }
   0x3   :  { %14 = vsyncpa [#allocation4], 0 }
   0x4   :  { %16 = vsyncpa [#allocation4 + $0x1], 0  ;;  %s1701_s18 = smov 0   ;;  %s1703_s19 = smov 0  }
   0x5   :  { %s1705_s20 = smov 0   ;;  %s1707_s21 = smov 0  }
   0x6 LB: > { %s1722_s22 = sadd.s32 4294967295, %s1661_s21   ;;  %s1100_s23 = sadd.s32 4294967294, %s1661_s21   ;;  %s1661_s21 = sphi %s1707_s21, %s2161_s21   ;;  %s1657_s20 = sphi %s1705_s20, %s2160_s20   ;;  %s1653_s19 = sphi %s1703_s19, %s2159_s19   ;;  %s1649_s18 = sphi %s1701_s18, %s2158_s18  }
   0x7   : > { %p42_p0 = scmp.ne.s32.totalorder %s1653_s19, %s1649_s18  ;;  %p2139_p1 = scmp.eq.s32.totalorder %s1722_s22, 0 }
   0x8   : > { %p150_p2 = scmp.eq.s32.totalorder %s1722_s22, 1  ;;  %p156_p3 = scmp.eq.s32.totalorder %s1100_s23, 1 }
   0x9   : > { %p1731_p4 = por %p2139_p1, %p42_p0  ;;  %p1101_p5 = scmp.ge.s32.totalorder %s1661_s21, 1 }
   0xa   : > { %p1736_p6 = por %p156_p3, %p42_p0  ;;  %p163_p7 = scmp.lt.s32.totalorder %s1661_s21, 3 }
   0xb   : > { %s2144_s24 = scalar_select %p1731_p4, 1, 0 }
   0xc   : > { %s2145_s25 = scalar_select %p1736_p6, 1, 0 }
   0xd   : > { %p1741_p8 = pnand %p1101_p5, %p163_p7  ;;  %s1663_s27 = smov [#allocation5]  }
   0xe   : > { %s175_s28 = sshll.u32 %s1663_s27, 4  ;;  %s1664_s30 = smov [#allocation7]   ;;  %s176_s28 = int_to_ptr.vmem [resolvable:$true] %s175_s28 }
   0xf   : > { %s2146_s26 = scalar_select %p1741_p8, 1, 0 }
  0x10   : > { %p1390_p9 = pneg %p1741_p8  ;;  %s191_s6 = sshll.u32 %s1664_s30, 4  ;;  %s192_s6 = int_to_ptr.vmem [resolvable:$true] %s191_s6 }
  0x11   : > { %s1524_s7 = scalar_lea.vmem %s176_s28, 2048  ;;  %p1532_p5 = scmp.lt.s32.totalorder %s176_s28, %s176_s28 }
  0x12   : > { %p1750_p11 = pnand %p1390_p9, %p2139_p1  ;;  %p1525_p13 = scmp.ne.s32.totalorder %s176_s28, %s1524_s7 }
  0x13   : > { %p1533_p7 = scmp.lt.s32.totalorder %s1524_s7, %s1524_s7 }
  0x14   : > { %p1515_p12 = pneg %p1750_p11 }
  0x15   : > { %p1534_p10 = por %p1533_p7, %p1532_p5 }
  0x16   : > { %p1527_p0 = pnand %p1525_p13, %p1515_p12 }
  0x18   : > { %p1528_p3 = pneg %p1527_p0 }
  0x1a   : > { %p1535_p9 = pnand %p1534_p10, %p1528_p3 }
  0x1c   : > { %1538 = shalt.err (!%p1535_p9)
}
  0x1d   : > { %s2140_s8 = smov 128   ;;  %s1666_s9 = smov 8  }
  0x1e   : > { %1393 = dma.hbm_to_vmem [thread:$0]  (!%p1750_p11), %s2134_s1, 2048, %s176_s28, [#allocation6], %s2140_s8, %s2140_s8, %s1666_s9  }
  0x1f   : > { %s1550_s12 = scalar_lea.vmem %s192_s6, 2048  ;;  %p1558_p10 = scmp.lt.s32.totalorder %s192_s6, %s192_s6 }
  0x20   : > { %p1551_p13 = scmp.ne.s32.totalorder %s192_s6, %s1550_s12  ;;  %p1559_p3 = scmp.lt.s32.totalorder %s1550_s12, %s1550_s12 }
  0x22   : > { %p1553_p0 = pnand %p1551_p13, %p1515_p12  ;;  %p1560_p7 = por %p1559_p3, %p1558_p10 }
  0x24   : > { %p1554_p5 = pneg %p1553_p0 }
  0x26   : > { %p1561_p9 = pnand %p1560_p7, %p1554_p5 }
  0x28   : > { %1564 = shalt.err (!%p1561_p9)
}
  0x29   : > { %1396 = dma.hbm_to_vmem [thread:$0]  (!%p1750_p11), %s2136_s3, 2048, %s192_s6, [#allocation6], %s2140_s8, %s2140_s8, %s1666_s9  }
  0x2a   : > { %s1779_s15 = sadd.s32 1, %s1661_s21   ;;  %s29_s16 = sadd.s32 1, %s1657_s20 }
  0x2b   : > { %s26_s17 = ssub.s32 %s1661_s21, %s1779_s15  ;;  %p36_p12 = scmp.ne.s32.totalorder %s1657_s20, %s1653_s19 }
  0x2c   : > { %p27_p13 = scmp.eq.s32.totalorder %s26_s17, 0  ;;  %p37_p0 = scmp.eq.s32.totalorder %s1661_s21, 0 }
  0x2d   : > { %p1789_p5 = por %p150_p2, %p36_p12  ;;  %p1407_p10 = scmp.lt.s32.totalorder %s1661_s21, 2 }
  0x2e   : > { %s1795_s27 = scalar_select %p27_p13, %s1657_s20, %s29_s16  }
  0x2f   : > { %s2148_s23 = scalar_select %p1789_p5, 1, 0 }
  0x30   : > { %p38_p3 = por %p37_p0, %p36_p12  ;;  %s208_s28 = sand.u32 1, %s1657_s20  }
  0x31   : > { %s1105_s29 = sshll.u32 %s208_s28, 8  ;;  %s1120_s30 = sshll.u32 %s1661_s21, 12 }
  0x32   : > { %s1802_s10 = scalar_lea.hbm %s2133_s0, %s1120_s30  ;;  %s212_s11 = scalar_lea.vmem [#allocation2], %s1105_s29 }
  0x33   : > { %s219_s12 = sshll.u32 %s212_s11, 4  ;;  %p1806_p2 = pnand %p1407_p10, %p38_p3  ;;  %s1804_s12 = int_to_ptr.vmem [resolvable:$true] %s219_s12 }
  0x34   : > { %s1810_s14 = scalar_lea.sflag [#allocation3], %s208_s28  ;;  %s1565_s16 = scalar_lea.hbm %s1802_s10, 4096 }
  0x35   : > { %p1566_p11 = scmp.ne.s32.totalorder %s1802_s10, %s1565_s16  ;;  %p1567_p7 = pneg %p1806_p2 }
  0x36   : > { %s1570_s29 = scalar_lea.hbm %s2133_s0, 8192  ;;  %p1571_p13 = scmp.lt.s32.totalorder %s1802_s10, %s2133_s0 }
  0x37   : > { %p1568_p9 = pnand %p1567_p7, %p1566_p11  ;;  %p1572_p0 = scmp.lt.s32.totalorder %s1570_s29, %s1565_s16 }
  0x39   : > { %p1569_p12 = pneg %p1568_p9  ;;  %p1573_p10 = por %p1572_p0, %p1571_p13 }
  0x3b   : > { %p1574_p3 = pnand %p1573_p10, %p1569_p12 }
  0x3d   : > { %1577 = shalt.err (!%p1574_p3)
}
  0x3e   : > { %s1578_s28 = scalar_lea.vmem %s1804_s12, 4096  ;;  %s1667_s11 = smov [#allocation2]  }
  0x3f   : > { %p1579_p1 = scmp.ne.s32.totalorder %s1804_s12, %s1578_s28  ;;  %s1583_s8 = sshll.u32 %s1667_s11, 4  ;;  %s1584_s8 = int_to_ptr.vmem [resolvable:$false] %s1583_s8 }
  0x40   : > { %s1585_s17 = scalar_lea.vmem %s1584_s8, 8192  ;;  %p1586_p9 = scmp.lt.s32.totalorder %s1804_s12, %s1584_s8 }
  0x41   : > { %p1581_p6 = pnand %p1579_p1, %p1567_p7  ;;  %p1587_p5 = scmp.lt.s32.totalorder %s1585_s17, %s1578_s28 }
  0x43   : > { %p1582_p11 = pneg %p1581_p6  ;;  %p1588_p4 = por %p1587_p5, %p1586_p9 }
  0x45   : > { %p1589_p8 = pnand %p1588_p4, %p1582_p11 }
  0x47   : > { %1592 = shalt.err (!%p1589_p8)
}
  0x48   : > { %s2150_s16 = smov 128   ;;  %p2151_p1 = scmp.ne.s32.totalorder %s2146_s26, 0 }
  0x49   : > { %1400 = dma.hbm_to_vmem [thread:$0]  (!%p1806_p2), %s1802_s10, 4096, %s1804_s12, %s1810_s14, %s2150_s16, %s2150_s16, %s1666_s9  }
  0x4a   : > { %231 = sbr.rel (%p2151_p1) target bundleno = 605 (0x25d), region = 40  ;;  %s1837_s30 = sand.u32 (!%p2151_p1), 1, %s1653_s19  }
  0x4b   : > { %s1109_s8 = sshll.u32 (!%p2151_p1), %s1837_s30, 8  ;;  %s234_s29 = scalar_lea.sflag (!%p2151_p1), [#allocation3], %s1837_s30 }
  0x4c   : > { %s1843_s13 = scalar_lea.vmem (!%p2151_p1), [#allocation2], %s1109_s8  ;;  %p2152_p4 = scmp.ne.s32.totalorder (!%p2151_p1), %s2144_s24, 0 }
  0x4f   : > { %1636 = dma.done.wait (%p2152_p4), %s234_s29, 4096  }
  0x50   : > { %1638 = vsyncadd (%p2152_p4), %s234_s29, 4294963200  ;;  %p2153_p6 = scmp.eq.s32.totalorder %s1722_s22, 0 }
  0x52   : > { %1640 = dma.done.wait (%p2153_p6), [#allocation6], 4096   ;;  %p2154_p8 = pmov %p2153_p6 }
  0x53   : > { %v321_v0 = vld [vmem:[#allocation5 + $0x78] sm:$0xff]  ;;  %v320_v1 = vld [vmem:[#allocation5 + $0x70] sm:$0xff]  ;;  %v319_v2 = vld [vmem:[#allocation5 + $0x68] sm:$0xff]  ;;  %s2018_s12 = scalar_lea.vmem [#allocation8], %s1109_s8  ;;  %s1121_s14 = sshll.u32 %s1722_s22, 12 }
  0x54   : > { %1642 = vsyncadd (%p2154_p8), [#allocation6], 4294963200  ;;  %1218 = vmatprep.subr.mxu0 %v321_v0  ;;  %v318_v3 = vld [vmem:[#allocation5 + $0x60] sm:$0xff]  ;;  %v317_v5 = vld [vmem:[#allocation5 + $0x58] sm:$0xff]  ;;  %s1008_s6 = sshll.u32 %s2018_s12, 4  ;;  %s2085_s11 = scalar_lea.hbm %s2138_s5, %s1121_s14  ;;  %s2087_s6 = int_to_ptr.vmem [resolvable:$true] %s1008_s6 }
  0x55   : > { %1219 = vmatpush3.msra.mxu0 %v321_v0  ;;  %v274_v4 = vld [vmem:[%s1843_s13] sm:$0xff]  ;;  %v316_v6 = vld [vmem:[#allocation5 + $0x50] sm:$0xff]  ;;  %v315_v7 = vld [vmem:[#allocation5 + $0x48] sm:$0xff]  ;;  %s995_s22 = scalar_lea.sflag [#allocation4], %s1837_s30  ;;  %s1593_s17 = scalar_lea.vmem %s2087_s6, 4096 }
  0x56   : > { %1220 = vmatprep.subr.mxu0 %v320_v1  ;;  %1250 = vmatprep.mubr.f32.mxu0 %v274_v4  ;;  %v314_v8 = vld [vmem:[#allocation5 + $0x40] sm:$0xff]  ;;  %v313_v9 = vld [vmem:[#allocation5 + $0x38] sm:$0xff]  ;;  %v312_v10 = vld [vmem:[#allocation5 + $0x30] sm:$0xff]  ;;  %p1594_p5 = scmp.ne.s32.totalorder %s2087_s6, %s1593_s17  ;;  %p2155_p2 = scmp.ne.s32.totalorder %s2148_s23, 0 }
  0x57   : > { %1221 = vmatpush3.msra.mxu0 %v320_v1  ;;  %v729_v11 = vld [vmem:[#allocation7 + $0x78] sm:$0xff]  ;;  %v728_v12 = vld [vmem:[#allocation7 + $0x70] sm:$0xff]  ;;  %v311_v13 = vld [vmem:[#allocation5 + $0x28] sm:$0xff]  ;;  %s1668_s16 = smov [#allocation8]  }
  0x58   : > { %1222 = vmatprep.subr.mxu0 %v319_v2  ;;  %1298 = vmatprep.subr.mxu1 %v729_v11  ;;  %v727_v14 = vld [vmem:[#allocation7 + $0x68] sm:$0xff]  ;;  %v310_v15 = vld [vmem:[#allocation5 + $0x20] sm:$0xff]  ;;  %v309_v16 = vld [vmem:[#allocation5 + $0x18] sm:$0xff]  ;;  %p1595_p7 = pnand %p1594_p5, %p2155_p2  ;;  %s1597_s8 = sshll.u32 %s1668_s16, 4  ;;  %s1598_s8 = int_to_ptr.vmem [resolvable:$false] %s1597_s8 }
  0x59   : > { %1223 = vmatpush3.msra.mxu0 %v319_v2  ;;  %1299 = vmatpush3.msra.mxu1 %v729_v11  ;;  %v308_v17 = vld [vmem:[#allocation5 + $0x10] sm:$0xff]  ;;  %v307_v18 = vld [vmem:[#allocation5 + $0x8] sm:$0xff]  ;;  %v306_v19 = vld [vmem:[#allocation5] sm:$0xff]  ;;  %s1599_s29 = scalar_lea.vmem %s1598_s8, 8192  ;;  %p1600_p13 = scmp.lt.s32.totalorder %s2087_s6, %s1598_s8 }
  0x5a   : > { %1224 = vmatprep.subr.mxu0 %v318_v3  ;;  %1300 = vmatprep.subr.mxu1 %v728_v12  ;;  %v275_v20 = vld [vmem:[%s1843_s13 + $0x8] sm:$0xff]  ;;  %v276_v21 = vld [vmem:[%s1843_s13 + $0x10] sm:$0xff]  ;;  %v277_v22 = vld [vmem:[%s1843_s13 + $0x18] sm:$0xff]  ;;  %p1596_p12 = pneg %p1595_p7  ;;  %p1601_p0 = scmp.lt.s32.totalorder %s1599_s29, %s1593_s17 }
  0x5b   : > { %1225 = vmatpush3.msra.mxu0 %v318_v3  ;;  %1301 = vmatpush3.msra.mxu1 %v728_v12  ;;  %v278_v23 = vld [vmem:[%s1843_s13 + $0x20] sm:$0xff]  ;;  %v279_v24 = vld [vmem:[%s1843_s13 + $0x28] sm:$0xff]  ;;  %v280_v25 = vld [vmem:[%s1843_s13 + $0x30] sm:$0xff] }
  0x5c   : > { %1226 = vmatprep.subr.mxu0 %v317_v5  ;;  %1302 = vmatprep.subr.mxu1 %v727_v14  ;;  %v281_v26 = vld [vmem:[%s1843_s13 + $0x38] sm:$0xff]  ;;  %v282_v27 = vld [vmem:[%s1843_s13 + $0x40] sm:$0xff]  ;;  %v283_v28 = vld [vmem:[%s1843_s13 + $0x48] sm:$0xff]  ;;  %p1602_p10 = por %p1601_p0, %p1600_p13 }
  0x5d   : > { %1227 = vmatpush3.msra.mxu0 %v317_v5  ;;  %1303 = vmatpush3.msra.mxu1 %v727_v14  ;;  %v284_v29 = vld [vmem:[%s1843_s13 + $0x50] sm:$0xff]  ;;  %v285_v30 = vld [vmem:[%s1843_s13 + $0x58] sm:$0xff]  ;;  %v286_v31 = vld [vmem:[%s1843_s13 + $0x60] sm:$0xff] }
  0x5e   : > { %1228 = vmatprep.subr.mxu0 %v316_v6  ;;  %v287_v32 = vld [vmem:[%s1843_s13 + $0x68] sm:$0xff]  ;;  %v288_v33 = vld [vmem:[%s1843_s13 + $0x70] sm:$0xff]  ;;  %v289_v34 = vld [vmem:[%s1843_s13 + $0x78] sm:$0xff]  ;;  %p1603_p3 = pnand %p1602_p10, %p1596_p12 }
  0x5f   : > { %1229 = vmatpush3.msra.mxu0 %v316_v6  ;;  %v290_v35 = vld [vmem:[%s1843_s13 + $0x80] sm:$0xff]  ;;  %v291_v36 = vld [vmem:[%s1843_s13 + $0x88] sm:$0xff]  ;;  %v292_v37 = vld [vmem:[%s1843_s13 + $0x90] sm:$0xff] }
  0x60   : > { %1230 = vmatprep.subr.mxu0 %v315_v7  ;;  %v293_v38 = vld [vmem:[%s1843_s13 + $0x98] sm:$0xff]  ;;  %v294_v39 = vld [vmem:[%s1843_s13 + $0xa0] sm:$0xff]  ;;  %v295_v40 = vld [vmem:[%s1843_s13 + $0xa8] sm:$0xff] }
  0x61   : > { %1231 = vmatpush3.msra.mxu0 %v315_v7  ;;  %v296_v41 = vld [vmem:[%s1843_s13 + $0xb0] sm:$0xff]  ;;  %v297_v42 = vld [vmem:[%s1843_s13 + $0xb8] sm:$0xff]  ;;  %v298_v43 = vld [vmem:[%s1843_s13 + $0xc0] sm:$0xff] }
  0x62   : > { %1232 = vmatprep.subr.mxu0 %v314_v8  ;;  %v299_v44 = vld [vmem:[%s1843_s13 + $0xc8] sm:$0xff]  ;;  %v300_v45 = vld [vmem:[%s1843_s13 + $0xd0] sm:$0xff]  ;;  %v301_v46 = vld [vmem:[%s1843_s13 + $0xd8] sm:$0xff] }
  0x63   : > { %1233 = vmatpush3.msra.mxu0 %v314_v8  ;;  %v302_v47 = vld [vmem:[%s1843_s13 + $0xe0] sm:$0xff]  ;;  %v303_v48 = vld [vmem:[%s1843_s13 + $0xe8] sm:$0xff]  ;;  %v304_v49 = vld [vmem:[%s1843_s13 + $0xf0] sm:$0xff] }
  0x64   : > { %1234 = vmatprep.subr.mxu0 %v313_v9  ;;  %v305_v50 = vld [vmem:[%s1843_s13 + $0xf8] sm:$0xff]  ;;  %v726_v51 = vld [vmem:[#allocation7 + $0x60] sm:$0xff]  ;;  %v724_v53 = vld [vmem:[#allocation7 + $0x50] sm:$0xff] }
  0x65   : > { %1235 = vmatpush3.msra.mxu0 %v313_v9  ;;  %1304 = vmatprep.subr.mxu1 %v726_v51  ;;  %v725_v52 = vld [vmem:[#allocation7 + $0x58] sm:$0xff]  ;;  %v723_v54 = vld [vmem:[#allocation7 + $0x48] sm:$0xff]  ;;  %v722_v55 = vld [vmem:[#allocation7 + $0x40] sm:$0xff] }
  0x66   : > { %1236 = vmatprep.subr.mxu0 %v312_v10  ;;  %1305 = vmatpush3.msra.mxu1 %v726_v51  ;;  %v721_v56 = vld [vmem:[#allocation7 + $0x38] sm:$0xff]  ;;  %v720_v57 = vld [vmem:[#allocation7 + $0x30] sm:$0xff]  ;;  %v719_v58 = vld [vmem:[#allocation7 + $0x28] sm:$0xff] }
  0x67   : > { %1237 = vmatpush3.msra.mxu0 %v312_v10  ;;  %1306 = vmatprep.subr.mxu1 %v725_v52  ;;  %v718_v59 = vld [vmem:[#allocation7 + $0x20] sm:$0xff]  ;;  %v717_v60 = vld [vmem:[#allocation7 + $0x18] sm:$0xff]  ;;  %v716_v61 = vld [vmem:[#allocation7 + $0x10] sm:$0xff] }
  0x68   : > { %1238 = vmatprep.subr.mxu0 %v311_v13  ;;  %1307 = vmatpush3.msra.mxu1 %v725_v52  ;;  %v715_v62 = vld [vmem:[#allocation7 + $0x8] sm:$0xff]  ;;  %v714_v63 = vld [vmem:[#allocation7] sm:$0xff] }
  0x69   : > { %1239 = vmatpush3.msra.mxu0 %v311_v13  ;;  %1308 = vmatprep.subr.mxu1 %v724_v53  ;;  %v1888_v0 = vld [vmem:[%s2135_s2] ss:$0 sm:$0xff] }
  0x6a   : > { %1240 = vmatprep.subr.mxu0 %v310_v15  ;;  %1309 = vmatpush3.msra.mxu1 %v724_v53 }
  0x6b   : > { %1241 = vmatpush3.msra.mxu0 %v310_v15  ;;  %1310 = vmatprep.subr.mxu1 %v723_v54 }
  0x6c   : > { %1242 = vmatprep.subr.mxu0 %v309_v16  ;;  %1311 = vmatpush3.msra.mxu1 %v723_v54 }
  0x6d   : > { %1243 = vmatpush3.msra.mxu0 %v309_v16  ;;  %1312 = vmatprep.subr.mxu1 %v722_v55 }
  0x6e   : > { %1244 = vmatprep.subr.mxu0 %v308_v17  ;;  %1313 = vmatpush3.msra.mxu1 %v722_v55 }
  0x6f   : > { %1245 = vmatpush3.msra.mxu0 %v308_v17  ;;  %1314 = vmatprep.subr.mxu1 %v721_v56 }
  0x70   : > { %1246 = vmatprep.subr.mxu0 %v307_v18  ;;  %1315 = vmatpush3.msra.mxu1 %v721_v56 }
  0x71   : > { %1247 = vmatpush3.msra.mxu0 %v307_v18  ;;  %1316 = vmatprep.subr.mxu1 %v720_v57 }
  0x72   : > { %1248 = vmatprep.subr.mxu0 %v306_v19  ;;  %1317 = vmatpush3.msra.mxu1 %v720_v57 }
  0x73   : > { %1249 = vmatpush3.msra.mxu0 %v306_v19  ;;  %1318 = vmatprep.subr.mxu1 %v719_v58 }
  0x74   : > { %1251 = vmatmul.mubr.f32.vlgmr.msra.gmra.mxu0 %v275_v20  ;;  %1319 = vmatpush3.msra.mxu1 %v719_v58 }
  0x75   : > { %1253 = vmatprep.mubr.f32.mxu0 %v276_v21  ;;  %1320 = vmatprep.subr.mxu1 %v718_v59 }
  0x76   : > { %1321 = vmatpush3.msra.mxu1 %v718_v59 }
  0x77   : > { %1322 = vmatprep.subr.mxu1 %v717_v60 }
  0x78   : > { %1254 = vmatmul.mubr.f32.gmra.mxu0 %v277_v22  ;;  %1323 = vmatpush3.msra.mxu1 %v717_v60 }
  0x79   : > { %1256 = vmatprep.mubr.f32.mxu0 %v278_v23  ;;  %1324 = vmatprep.subr.mxu1 %v716_v61 }
  0x7a   : > { %1325 = vmatpush3.msra.mxu1 %v716_v61 }
  0x7b   : > { %1326 = vmatprep.subr.mxu1 %v715_v62 }
  0x7c   : > { %1257 = vmatmul.mubr.f32.gmra.mxu0 %v279_v24  ;;  %1327 = vmatpush3.msra.mxu1 %v715_v62 }
  0x7d   : > { %1259 = vmatprep.mubr.f32.mxu0 %v280_v25  ;;  %1328 = vmatprep.subr.mxu1 %v714_v63 }
  0x7e   : > { %1329 = vmatpush3.msra.mxu1 %v714_v63 }
  0x80   : > { %1260 = vmatmul.mubr.f32.gmra.mxu0 %v281_v26 }
  0x81   : > { %1262 = vmatprep.mubr.f32.mxu0 %v282_v27 }
  0x84   : > { %1263 = vmatmul.mubr.f32.gmra.mxu0 %v283_v28 }
  0x85   : > { %1265 = vmatprep.mubr.f32.mxu0 %v284_v29 }
  0x88   : > { %1266 = vmatmul.mubr.f32.gmra.mxu0 %v285_v30 }
  0x89   : > { %1268 = vmatprep.mubr.f32.mxu0 %v286_v31 }
  0x8c   : > { %1269 = vmatmul.mubr.f32.gmra.mxu0 %v287_v32 }
  0x8d   : > { %1271 = vmatprep.mubr.f32.mxu0 %v288_v33 }
  0x90   : > { %1272 = vmatmul.mubr.f32.gmra.mxu0 %v289_v34 }
  0x91   : > { %1274 = vmatprep.mubr.f32.mxu0 %v290_v35 }
  0x94   : > { %1275 = vmatmul.mubr.f32.gmra.mxu0 %v291_v36 }
  0x95   : > { %1277 = vmatprep.mubr.f32.mxu0 %v292_v37 }
  0x98   : > { %1278 = vmatmul.mubr.f32.gmra.mxu0 %v293_v38 }
  0x99   : > { %1280 = vmatprep.mubr.f32.mxu0 %v294_v39 }
  0x9c   : > { %1281 = vmatmul.mubr.f32.gmra.mxu0 %v295_v40 }
  0x9d   : > { %1283 = vmatprep.mubr.f32.mxu0 %v296_v41 }
  0xa0   : > { %1284 = vmatmul.mubr.f32.gmra.mxu0 %v297_v42 }
  0xa1   : > { %1286 = vmatprep.mubr.f32.mxu0 %v298_v43 }
  0xa4   : > { %1287 = vmatmul.mubr.f32.gmra.mxu0 %v299_v44 }
  0xa5   : > { %1289 = vmatprep.mubr.f32.mxu0 %v300_v45 }
  0xa8   : > { %1290 = vmatmul.mubr.f32.gmra.mxu0 %v301_v46 }
  0xa9   : > { %1292 = vmatprep.mubr.f32.mxu0 %v302_v47 }
  0xac   : > { %1293 = vmatmul.mubr.f32.gmra.mxu0 %v303_v48 }
  0xad   : > { %1295 = vmatprep.mubr.f32.mxu0 %v304_v49 }
  0xb0   : > { %1296 = vmatmul.mubr.f32.gmra.mxu0 %v305_v50 }
 0x134   : > { %v1252_v1 = vpop.f32.mrf.mxu0 }
 0x135   : > { %v401_v2 = vadd.f32 %v1252_v1, %v1888_v0 }
 0x136   : > { %v395_v3 = vpop.f32.mrf.mxu0 }
 0x137   : > { %v587_v4 = vmul.f32 0.70710677, %v401_v2  ;;  %v396_v5 = vadd.f32 %v1888_v0, %v395_v3  ;;  %v555_v37 = vmul.f32 0.5, %v401_v2 }
 0x138   : > { %v1255_v6 = vpop.f32.mrf.mxu0 }
 0x139   : > { %1449 = verf.f32 %v587_v4  ;;  %v586_v7 = vmul.f32 0.70710677, %v396_v5  ;;  %v411_v8 = vadd.f32 %v1255_v6, %v1888_v0  ;;  %v554_v39 = vmul.f32 0.5, %v396_v5 }
 0x13a   : > { %v405_v9 = vpop.f32.mrf.mxu0 }
 0x13b   : > { %1451 = verf.f32 %v586_v7  ;;  %v589_v10 = vmul.f32 0.70710677, %v411_v8  ;;  %v406_v11 = vadd.f32 %v1888_v0, %v405_v9  ;;  %v557_v54 = vmul.f32 0.5, %v411_v8 }
 0x13c   : > { %v1258_v12 = vpop.f32.mrf.mxu0 }
 0x13d   : > { %1453 = verf.f32 %v589_v10  ;;  %v588_v13 = vmul.f32 0.70710677, %v406_v11  ;;  %v421_v14 = vadd.f32 %v1258_v12, %v1888_v0  ;;  %v556_v51 = vmul.f32 0.5, %v406_v11 }
 0x13e   : > { %v415_v15 = vpop.f32.mrf.mxu0 }
 0x13f   : > { %1455 = verf.f32 %v588_v13  ;;  %v591_v16 = vmul.f32 0.70710677, %v421_v14  ;;  %v416_v17 = vadd.f32 %v1888_v0, %v415_v15  ;;  %v559_v2 = vmul.f32 0.5, %v421_v14 }
 0x140   : > { %v1261_v18 = vpop.f32.mrf.mxu0 }
 0x141   : > { %1457 = verf.f32 %v591_v16  ;;  %v590_v19 = vmul.f32 0.70710677, %v416_v17  ;;  %v1897_v20 = vadd.f32 %v1261_v18, %v1888_v0  ;;  %v558_v3 = vmul.f32 0.5, %v416_v17 }
 0x142   : > { %v425_v21 = vpop.f32.mrf.mxu0 }
 0x143   : > { %1459 = verf.f32 %v590_v19  ;;  %v593_v22 = vmul.f32 0.70710677, %v1897_v20  ;;  %v1901_v23 = vadd.f32 %v1888_v0, %v425_v21  ;;  %v561_v19 = vmul.f32 0.5, %v1897_v20 }
 0x144   : > { %v1264_v24 = vpop.f32.mrf.mxu0 }
 0x145   : > { %1461 = verf.f32 %v593_v22  ;;  %v592_v25 = vmul.f32 0.70710677, %v1901_v23  ;;  %v1905_v26 = vadd.f32 %v1264_v24, %v1888_v0  ;;  %v560_v16 = vmul.f32 0.5, %v1901_v23 }
 0x146   : > { %v1450_v27 = vpop.eup %1449  ;;  %v435_v28 = vpop.f32.mrf.mxu0 }
 0x147   : > { %1463 = verf.f32 %v592_v25  ;;  %v595_v29 = vmul.f32 0.70710677, %v1905_v26  ;;  %v1909_v30 = vadd.f32 %v1888_v0, %v435_v28  ;;  %v651_v33 = vadd.f32 1.0, %v1450_v27 }
 0x148   : > { %v1452_v31 = vpop.eup %1451  ;;  %v1267_v32 = vpop.f32.mrf.mxu0  ;;  %v563_v20 = vmul.f32 0.5, %v1905_v26 }
 0x149   : > { %1465 = verf.f32 %v595_v29  ;;  %v594_v34 = vmul.f32 0.70710677, %v1909_v30  ;;  %v1913_v35 = vadd.f32 %v1267_v32, %v1888_v0  ;;  %v650_v40 = vadd.f32 1.0, %v1452_v31 }
 0x14a   : > { %v1454_v36 = vpop.eup %1453  ;;  %v445_v38 = vpop.f32.mrf.mxu0  ;;  %v683_v46 = vmul.f32 %v651_v33, %v555_v37  ;;  %v562_v33 = vmul.f32 0.5, %v1909_v30 }
 0x14b   : > { %1467 = verf.f32 %v594_v34  ;;  %v597_v41 = vmul.f32 0.70710677, %v1913_v35  ;;  %v1917_v42 = vadd.f32 %v1888_v0, %v445_v38  ;;  %v682_v45 = vmul.f32 %v650_v40, %v554_v39 }
 0x14c   : > { %v1456_v43 = vpop.eup %1455  ;;  %v1270_v44 = vpop.f32.mrf.mxu0  ;;  %v653_v49 = vadd.f32 1.0, %v1454_v36 }
 0x14d   : > { %1469 = verf.f32 %v597_v41  ;;  %v596_v47 = vmul.f32 0.70710677, %v1917_v42  ;;  %v1921_v48 = vadd.f32 %v1270_v44, %v1888_v0  ;;  %1330 = vmatprep.mubr.f32.mxu1 %v682_v45  ;;  %v652_v53 = vadd.f32 1.0, %v1456_v43 }
 0x14e   : > { %v1458_v50 = vpop.eup %1457  ;;  %v455_v52 = vpop.f32.mrf.mxu0  ;;  %1331 = vmatmul.mubr.f32.vlgmr.msra.gmra.mxu1 %v683_v46  ;;  %v685_v63 = vmul.f32 %v653_v49, %v557_v54  ;;  %v564_v46 = vmul.f32 0.5, %v1917_v42 }
 0x14f   : > { %1471 = verf.f32 %v596_v47  ;;  %v599_v55 = vmul.f32 0.70710677, %v1921_v48  ;;  %v1925_v56 = vadd.f32 %v1888_v0, %v455_v52  ;;  %v684_v59 = vmul.f32 %v652_v53, %v556_v51 }
 0x150   : > { %v1460_v57 = vpop.eup %1459  ;;  %v1273_v58 = vpop.f32.mrf.mxu0  ;;  %v655_v60 = vadd.f32 1.0, %v1458_v50  ;;  %v565_v50 = vmul.f32 0.5, %v1913_v35  ;;  %v567_v35 = vmul.f32 0.5, %v1921_v48 }
 0x151   : > { %1473 = verf.f32 %v599_v55  ;;  %v598_v61 = vmul.f32 0.70710677, %v1925_v56  ;;  %v1929_v62 = vadd.f32 %v1273_v58, %v1888_v0  ;;  %1333 = vmatprep.mubr.f32.mxu1 %v684_v59  ;;  %v654_v5 = vadd.f32 1.0, %v1460_v57 }
 0x152   : > { %v1462_v1 = vpop.eup %1461  ;;  %v465_v4 = vpop.f32.mrf.mxu0  ;;  %1334 = vmatmul.mubr.f32.gmra.mxu1 %v685_v63  ;;  %v687_v11 = vmul.f32 %v655_v60, %v559_v2 }
 0x153   : > { %1475 = verf.f32 %v598_v61  ;;  %v601_v6 = vmul.f32 0.70710677, %v1929_v62  ;;  %v1933_v7 = vadd.f32 %v1888_v0, %v465_v4  ;;  %v686_v10 = vmul.f32 %v654_v5, %v558_v3 }
 0x154   : > { %v1464_v8 = vpop.eup %1463  ;;  %v1276_v9 = vpop.f32.mrf.mxu0  ;;  %v657_v14 = vadd.f32 1.0, %v1462_v1  ;;  %v566_v61 = vmul.f32 0.5, %v1925_v56 }
 0x155   : > { %1477 = verf.f32 %v601_v6  ;;  %v600_v12 = vmul.f32 0.70710677, %v1933_v7  ;;  %v1937_v13 = vadd.f32 %v1276_v9, %v1888_v0  ;;  %1336 = vmatprep.mubr.f32.mxu1 %v686_v10  ;;  %v656_v18 = vadd.f32 1.0, %v1464_v8 }
 0x156   : > { %v1466_v15 = vpop.eup %1465  ;;  %v475_v17 = vpop.f32.mrf.mxu0  ;;  %1337 = vmatmul.mubr.f32.gmra.mxu1 %v687_v11  ;;  %v689_v31 = vmul.f32 %v657_v14, %v561_v19  ;;  %v568_v11 = vmul.f32 0.5, %v1933_v7 }
 0x157   : > { %1479 = verf.f32 %v600_v12  ;;  %v603_v21 = vmul.f32 0.70710677, %v1937_v13  ;;  %v1943_v22 = vadd.f32 %v1888_v0, %v475_v17  ;;  %v688_v27 = vmul.f32 %v656_v18, %v560_v16 }
 0x158   : > { %v1468_v24 = vpop.eup %1467  ;;  %v1279_v25 = vpop.f32.mrf.mxu0  ;;  %v659_v28 = vadd.f32 1.0, %v1466_v15  ;;  %v569_v15 = vmul.f32 0.5, %v1929_v62  ;;  %v571_v62 = vmul.f32 0.5, %v1937_v13 }
 0x159   : > { %1481 = verf.f32 %v603_v21  ;;  %v602_v29 = vmul.f32 0.70710677, %v1943_v22  ;;  %v1947_v23 = vadd.f32 %v1279_v25, %v1888_v0  ;;  %1339 = vmatprep.mubr.f32.mxu1 %v688_v27  ;;  %v658_v36 = vadd.f32 1.0, %v1468_v24 }
 0x15a   : > { %v1470_v32 = vpop.eup %1469  ;;  %v485_v34 = vpop.f32.mrf.mxu0  ;;  %1340 = vmatmul.mubr.f32.gmra.mxu1 %v689_v31  ;;  %v691_v43 = vmul.f32 %v659_v28, %v563_v20 }
 0x15b   : > { %1483 = verf.f32 %v602_v29  ;;  %v605_v37 = vmul.f32 0.70710677, %v1947_v23  ;;  %v1953_v38 = vadd.f32 %v1888_v0, %v485_v34  ;;  %v690_v41 = vmul.f32 %v658_v36, %v562_v33 }
 0x15c   : > { %v1472_v39 = vpop.eup %1471  ;;  %v1282_v40 = vpop.f32.mrf.mxu0  ;;  %v661_v30 = vadd.f32 1.0, %v1470_v32  ;;  %v570_v29 = vmul.f32 0.5, %v1943_v22 }
 0x15d   : > { %1485 = verf.f32 %v605_v37  ;;  %v604_v44 = vmul.f32 0.70710677, %v1953_v38  ;;  %v1957_v26 = vadd.f32 %v1282_v40, %v1888_v0  ;;  %1342 = vmatprep.mubr.f32.mxu1 %v690_v41  ;;  %v660_v49 = vadd.f32 1.0, %v1472_v39 }
 0x15e   : > { %v1474_v45 = vpop.eup %1473  ;;  %v495_v47 = vpop.f32.mrf.mxu0  ;;  %1343 = vmatmul.mubr.f32.gmra.mxu1 %v691_v43  ;;  %v693_v59 = vmul.f32 %v661_v30, %v565_v50  ;;  %v572_v43 = vmul.f32 0.5, %v1953_v38 }
 0x15f   : > { %1487 = verf.f32 %v604_v44  ;;  %v607_v51 = vmul.f32 0.70710677, %v1957_v26  ;;  %v1963_v52 = vadd.f32 %v1888_v0, %v495_v47  ;;  %v692_v55 = vmul.f32 %v660_v49, %v564_v46 }
 0x160   : > { %v1476_v53 = vpop.eup %1475  ;;  %v1285_v54 = vpop.f32.mrf.mxu0  ;;  %v663_v57 = vadd.f32 1.0, %v1474_v45  ;;  %v573_v45 = vmul.f32 0.5, %v1947_v23 }
 0x161   : > { %1489 = verf.f32 %v607_v51  ;;  %v606_v58 = vmul.f32 0.70710677, %v1963_v52  ;;  %v1967_v42 = vadd.f32 %v1285_v54, %v1888_v0  ;;  %1345 = vmatprep.mubr.f32.mxu1 %v692_v55  ;;  %v662_v1 = vadd.f32 1.0, %v1476_v53 }
 0x162   : > { %v1478_v60 = vpop.eup %1477  ;;  %v505_v63 = vpop.f32.mrf.mxu0  ;;  %1346 = vmatmul.mubr.f32.gmra.mxu1 %v693_v59  ;;  %v695_v8 = vmul.f32 %v663_v57, %v567_v35  ;;  %v574_v23 = vmul.f32 0.5, %v1963_v52 }
 0x163   : > { %1491 = verf.f32 %v606_v58  ;;  %v609_v2 = vmul.f32 0.70710677, %v1967_v42  ;;  %v1973_v3 = vadd.f32 %v1888_v0, %v505_v63  ;;  %v694_v6 = vmul.f32 %v662_v1, %v566_v61 }
 0x164   : > { %v1480_v4 = vpop.eup %1479  ;;  %v1288_v5 = vpop.f32.mrf.mxu0  ;;  %v665_v56 = vadd.f32 1.0, %v1478_v60  ;;  %v575_v58 = vmul.f32 0.5, %v1957_v26  ;;  %v577_v52 = vmul.f32 0.5, %v1967_v42 }
 0x165   : > { %1493 = verf.f32 %v609_v2  ;;  %v608_v9 = vmul.f32 0.70710677, %v1973_v3  ;;  %v1977_v48 = vadd.f32 %v1288_v5, %v1888_v0  ;;  %1348 = vmatprep.mubr.f32.mxu1 %v694_v6  ;;  %v664_v14 = vadd.f32 1.0, %v1480_v4 }
 0x166   : > { %v1482_v10 = vpop.eup %1481  ;;  %v515_v12 = vpop.f32.mrf.mxu0  ;;  %1349 = vmatmul.mubr.f32.gmra.mxu1 %v695_v8  ;;  %v697_v27 = vmul.f32 %v665_v56, %v569_v15  ;;  %v576_v1 = vmul.f32 0.5, %v1973_v3 }
 0x167   : > { %1495 = verf.f32 %v608_v9  ;;  %v611_v16 = vmul.f32 0.70710677, %v1977_v48  ;;  %v1983_v17 = vadd.f32 %v1888_v0, %v515_v12  ;;  %v696_v21 = vmul.f32 %v664_v14, %v568_v11 }
 0x168   : > { %v1484_v18 = vpop.eup %1483  ;;  %v1291_v19 = vpop.f32.mrf.mxu0  ;;  %v667_v24 = vadd.f32 1.0, %v1482_v10  ;;  %v579_v14 = vmul.f32 0.5, %v1977_v48 }
 0x169   : > { %1497 = verf.f32 %v611_v16  ;;  %v610_v25 = vmul.f32 0.70710677, %v1983_v17  ;;  %v1987_v7 = vadd.f32 %v1291_v19, %v1888_v0  ;;  %1351 = vmatprep.mubr.f32.mxu1 %v696_v21  ;;  %v666_v32 = vadd.f32 1.0, %v1484_v18 }
 0x16a   : > { %v1486_v28 = vpop.eup %1485  ;;  %v525_v31 = vpop.f32.mrf.mxu0  ;;  %1352 = vmatmul.mubr.f32.gmra.mxu1 %v697_v27  ;;  %v699_v39 = vmul.f32 %v667_v24, %v571_v62 }
 0x16b   : > { %1499 = verf.f32 %v610_v25  ;;  %v613_v20 = vmul.f32 0.70710677, %v1987_v7  ;;  %v526_v33 = vadd.f32 %v1888_v0, %v525_v31  ;;  %v698_v37 = vmul.f32 %v666_v32, %v570_v29 }
 0x16c   : > { %v1488_v34 = vpop.eup %1487  ;;  %v1294_v36 = vpop.f32.mrf.mxu0  ;;  %v669_v13 = vadd.f32 1.0, %v1486_v28  ;;  %v581_v25 = vmul.f32 0.5, %v1987_v7 }
 0x16d   : > { %1501 = verf.f32 %v613_v20  ;;  %v612_v40 = vmul.f32 0.70710677, %v526_v33  ;;  %v1994_v41 = vadd.f32 %v1294_v36, %v1888_v0  ;;  %1354 = vmatprep.mubr.f32.mxu1 %v698_v37  ;;  %v668_v30 = vadd.f32 1.0, %v1488_v34 }
 0x16e   : > { %v1490_v22 = vpop.eup %1489  ;;  %v535_v44 = vpop.f32.mrf.mxu0  ;;  %1355 = vmatmul.mubr.f32.gmra.mxu1 %v699_v39  ;;  %v701_v38 = vmul.f32 %v669_v13, %v573_v45  ;;  %v580_v18 = vmul.f32 0.5, %v526_v33 }
 0x16f   : > { %1503 = verf.f32 %v612_v40  ;;  %v615_v46 = vmul.f32 0.70710677, %v1994_v41  ;;  %v536_v47 = vadd.f32 %v1888_v0, %v535_v44  ;;  %v700_v51 = vmul.f32 %v668_v30, %v572_v43 }
 0x170   : > { %v1492_v49 = vpop.eup %1491  ;;  %v1297_v50 = vpop.f32.mrf.mxu0  ;;  %v671_v53 = vadd.f32 1.0, %v1490_v22  ;;  %v583_v32 = vmul.f32 0.5, %v1994_v41  ;;  %v2013_v22 = vld [vmem:[%s2137_s4] ss:$0 sm:$0xff] }
 0x171   : > { %1505 = verf.f32 %v615_v46  ;;  %v614_v54 = vmul.f32 0.70710677, %v536_v47  ;;  %v551_v55 = vadd.f32 %v1297_v50, %v1888_v0  ;;  %1357 = vmatprep.mubr.f32.mxu1 %v700_v51  ;;  %v670_v60 = vadd.f32 1.0, %v1492_v49 }
 0x172   : > { %v1494_v57 = vpop.eup %1493  ;;  %v545_v59 = vpop.f32.mrf.mxu0  ;;  %1358 = vmatmul.mubr.f32.gmra.mxu1 %v701_v38  ;;  %v703_v4 = vmul.f32 %v671_v53, %v575_v58  ;;  %v582_v28 = vmul.f32 0.5, %v536_v47 }
 0x173   : > { %1507 = verf.f32 %v614_v54  ;;  %v617_v35 = vmul.f32 0.70710677, %v551_v55  ;;  %v546_v61 = vadd.f32 %v1888_v0, %v545_v59  ;;  %v702_v2 = vmul.f32 %v670_v60, %v574_v23 }
 0x174   : > { %v1496_v63 = vpop.eup %1495  ;;  %v673_v8 = vadd.f32 1.0, %v1494_v57  ;;  %v578_v0 = vmul.f32 0.5, %v1983_v17  ;;  %v585_v39 = vmul.f32 0.5, %v551_v55 }
 0x175   : > { %1509 = verf.f32 %v617_v35  ;;  %v616_v5 = vmul.f32 0.70710677, %v546_v61  ;;  %v672_v6 = vadd.f32 1.0, %v1496_v63  ;;  %1360 = vmatprep.mubr.f32.mxu1 %v702_v2  ;;  %v584_v34 = vmul.f32 0.5, %v546_v61 }
 0x176   : > { %v1498_v26 = vpop.eup %1497  ;;  %1361 = vmatmul.mubr.f32.gmra.mxu1 %v703_v4  ;;  %v705_v10 = vmul.f32 %v673_v8, %v577_v52 }
 0x177   : > { %1511 = verf.f32 %v616_v5  ;;  %v704_v9 = vmul.f32 %v672_v6, %v576_v1  ;;  %v675_v3 = vadd.f32 1.0, %v1498_v26 }
 0x178   : > { %v1500_v56 = vpop.eup %1499 }
 0x179   : > { %1363 = vmatprep.mubr.f32.mxu1 %v704_v9  ;;  %v674_v11 = vadd.f32 1.0, %v1500_v56  ;;  %v707_v19 = vmul.f32 %v675_v3, %v579_v14 }
 0x17a   : > { %v1502_v12 = vpop.eup %1501  ;;  %1364 = vmatmul.mubr.f32.gmra.mxu1 %v705_v10 }
 0x17b   : > { %v706_v15 = vmul.f32 %v674_v11, %v578_v0  ;;  %v677_v21 = vadd.f32 1.0, %v1502_v12 }
 0x17c   : > { %v1504_v16 = vpop.eup %1503 }
 0x17d   : > { %1366 = vmatprep.mubr.f32.mxu1 %v706_v15  ;;  %v676_v42 = vadd.f32 1.0, %v1504_v16  ;;  %v709_v62 = vmul.f32 %v677_v21, %v581_v25 }
 0x17e   : > { %v1506_v24 = vpop.eup %1505  ;;  %1367 = vmatmul.mubr.f32.gmra.mxu1 %v707_v19 }
 0x17f   : > { %v708_v17 = vmul.f32 %v676_v42, %v580_v18  ;;  %v679_v31 = vadd.f32 1.0, %v1506_v24 }
 0x180   : > { %v1508_v27 = vpop.eup %1507 }
 0x181   : > { %1369 = vmatprep.mubr.f32.mxu1 %v708_v17  ;;  %v678_v29 = vadd.f32 1.0, %v1508_v27  ;;  %v711_v36 = vmul.f32 %v679_v31, %v583_v32 }
 0x182   : > { %v1510_v48 = vpop.eup %1509  ;;  %1370 = vmatmul.mubr.f32.gmra.mxu1 %v709_v62 }
 0x183   : > { %v710_v20 = vmul.f32 %v678_v29, %v582_v28  ;;  %v681_v7 = vadd.f32 1.0, %v1510_v48 }
 0x184   : > { %v1512_v33 = vpop.eup %1511 }
 0x185   : > { %1372 = vmatprep.mubr.f32.mxu1 %v710_v20  ;;  %v680_v37 = vadd.f32 1.0, %v1512_v33  ;;  %v713_v13 = vmul.f32 %v681_v7, %v585_v39 }
 0x186   : > { %1373 = vmatmul.mubr.f32.gmra.mxu1 %v711_v36 }
 0x187   : > { %v712_v40 = vmul.f32 %v680_v37, %v584_v34 }
 0x189   : > { %1375 = vmatprep.mubr.f32.mxu1 %v712_v40 }
 0x18a   : > { %1376 = vmatmul.mubr.f32.gmra.mxu1 %v713_v13 }
 0x20e   : > { %v1332_v41 = vpop.f32.mrf.mxu1 }
 0x20f   : > { %v809_v43 = vadd.f32 %v1332_v41, %v2013_v22 }
 0x210   : > { %v803_v44 = vpop.f32.mrf.mxu1 }
 0x211   : > { %963 = vst [vmem:[%s2018_s12 + $0x8] sm:$0xff] %v809_v43  ;;  %v804_v30 = vadd.f32 %v2013_v22, %v803_v44 }
 0x212   : > { %v1335_v45 = vpop.f32.mrf.mxu1 }
 0x213   : > { %962 = vst [vmem:[%s2018_s12] sm:$0xff] %v804_v30  ;;  %v819_v46 = vadd.f32 %v1335_v45, %v2013_v22 }
 0x214   : > { %v813_v47 = vpop.f32.mrf.mxu1 }
 0x215   : > { %965 = vst [vmem:[%s2018_s12 + $0x18] sm:$0xff] %v819_v46  ;;  %v814_v49 = vadd.f32 %v2013_v22, %v813_v47 }
 0x216   : > { %v1338_v50 = vpop.f32.mrf.mxu1 }
 0x217   : > { %964 = vst [vmem:[%s2018_s12 + $0x10] sm:$0xff] %v814_v49  ;;  %v829_v51 = vadd.f32 %v1338_v50, %v2013_v22 }
 0x218   : > { %v823_v53 = vpop.f32.mrf.mxu1 }
 0x219   : > { %967 = vst [vmem:[%s2018_s12 + $0x28] sm:$0xff] %v829_v51  ;;  %v824_v54 = vadd.f32 %v2013_v22, %v823_v53 }
 0x21a   : > { %v1341_v55 = vpop.f32.mrf.mxu1 }
 0x21b   : > { %966 = vst [vmem:[%s2018_s12 + $0x20] sm:$0xff] %v824_v54  ;;  %v839_v38 = vadd.f32 %v1341_v55, %v2013_v22 }
 0x21c   : > { %v833_v57 = vpop.f32.mrf.mxu1 }
 0x21d   : > { %969 = vst [vmem:[%s2018_s12 + $0x38] sm:$0xff] %v839_v38  ;;  %v834_v58 = vadd.f32 %v2013_v22, %v833_v57 }
 0x21e   : > { %v1344_v23 = vpop.f32.mrf.mxu1 }
 0x21f   : > { %968 = vst [vmem:[%s2018_s12 + $0x30] sm:$0xff] %v834_v58  ;;  %v849_v59 = vadd.f32 %v1344_v23, %v2013_v22 }
 0x220   : > { %v843_v60 = vpop.f32.mrf.mxu1 }
 0x221   : > { %971 = vst [vmem:[%s2018_s12 + $0x48] sm:$0xff] %v849_v59  ;;  %v844_v35 = vadd.f32 %v2013_v22, %v843_v60 }
 0x222   : > { %v1347_v61 = vpop.f32.mrf.mxu1 }
 0x223   : > { %970 = vst [vmem:[%s2018_s12 + $0x40] sm:$0xff] %v844_v35  ;;  %v859_v63 = vadd.f32 %v1347_v61, %v2013_v22 }
 0x224   : > { %v853_v1 = vpop.f32.mrf.mxu1 }
 0x225   : > { %973 = vst [vmem:[%s2018_s12 + $0x58] sm:$0xff] %v859_v63  ;;  %v854_v2 = vadd.f32 %v2013_v22, %v853_v1 }
 0x226   : > { %v1350_v4 = vpop.f32.mrf.mxu1 }
 0x227   : > { %972 = vst [vmem:[%s2018_s12 + $0x50] sm:$0xff] %v854_v2  ;;  %v869_v5 = vadd.f32 %v1350_v4, %v2013_v22 }
 0x228   : > { %v863_v6 = vpop.f32.mrf.mxu1 }
 0x229   : > { %975 = vst [vmem:[%s2018_s12 + $0x68] sm:$0xff] %v869_v5  ;;  %v864_v8 = vadd.f32 %v2013_v22, %v863_v6 }
 0x22a   : > { %v1353_v26 = vpop.f32.mrf.mxu1 }
 0x22b   : > { %974 = vst [vmem:[%s2018_s12 + $0x60] sm:$0xff] %v864_v8  ;;  %v879_v52 = vadd.f32 %v1353_v26, %v2013_v22 }
 0x22c   : > { %v873_v9 = vpop.f32.mrf.mxu1 }
 0x22d   : > { %977 = vst [vmem:[%s2018_s12 + $0x78] sm:$0xff] %v879_v52  ;;  %v874_v56 = vadd.f32 %v2013_v22, %v873_v9 }
 0x22e   : > { %v1356_v0 = vpop.f32.mrf.mxu1 }
 0x22f   : > { %976 = vst [vmem:[%s2018_s12 + $0x70] sm:$0xff] %v874_v56  ;;  %v889_v10 = vadd.f32 %v1356_v0, %v2013_v22 }
 0x230   : > { %v883_v11 = vpop.f32.mrf.mxu1 }
 0x231   : > { %979 = vst [vmem:[%s2018_s12 + $0x88] sm:$0xff] %v889_v10  ;;  %v884_v3 = vadd.f32 %v2013_v22, %v883_v11 }
 0x232   : > { %v1359_v12 = vpop.f32.mrf.mxu1 }
 0x233   : > { %978 = vst [vmem:[%s2018_s12 + $0x80] sm:$0xff] %v884_v3  ;;  %v899_v14 = vadd.f32 %v1359_v12, %v2013_v22 }
 0x234   : > { %v893_v15 = vpop.f32.mrf.mxu1 }
 0x235   : > { %981 = vst [vmem:[%s2018_s12 + $0x98] sm:$0xff] %v899_v14  ;;  %v894_v16 = vadd.f32 %v2013_v22, %v893_v15 }
 0x236   : > { %v1362_v18 = vpop.f32.mrf.mxu1 }
 0x237   : > { %980 = vst [vmem:[%s2018_s12 + $0x90] sm:$0xff] %v894_v16  ;;  %v909_v19 = vadd.f32 %v1362_v18, %v2013_v22 }
 0x238   : > { %v903_v42 = vpop.f32.mrf.mxu1 }
 0x239   : > { %983 = vst [vmem:[%s2018_s12 + $0xa8] sm:$0xff] %v909_v19  ;;  %v904_v21 = vadd.f32 %v2013_v22, %v903_v42 }
 0x23a   : > { %v1365_v24 = vpop.f32.mrf.mxu1 }
 0x23b   : > { %982 = vst [vmem:[%s2018_s12 + $0xa0] sm:$0xff] %v904_v21  ;;  %v919_v25 = vadd.f32 %v1365_v24, %v2013_v22 }
 0x23c   : > { %v913_v17 = vpop.f32.mrf.mxu1 }
 0x23d   : > { %985 = vst [vmem:[%s2018_s12 + $0xb8] sm:$0xff] %v919_v25  ;;  %v914_v27 = vadd.f32 %v2013_v22, %v913_v17 }
 0x23e   : > { %v1368_v28 = vpop.f32.mrf.mxu1 }
 0x23f   : > { %984 = vst [vmem:[%s2018_s12 + $0xb0] sm:$0xff] %v914_v27  ;;  %v929_v62 = vadd.f32 %v1368_v28, %v2013_v22 }
 0x240   : > { %v923_v29 = vpop.f32.mrf.mxu1 }
 0x241   : > { %987 = vst [vmem:[%s2018_s12 + $0xc8] sm:$0xff] %v929_v62  ;;  %v924_v31 = vadd.f32 %v2013_v22, %v923_v29 }
 0x242   : > { %v1371_v48 = vpop.f32.mrf.mxu1 }
 0x243   : > { %986 = vst [vmem:[%s2018_s12 + $0xc0] sm:$0xff] %v924_v31  ;;  %v939_v32 = vadd.f32 %v1371_v48, %v2013_v22 }
 0x244   : > { %v933_v20 = vpop.f32.mrf.mxu1 }
 0x245   : > { %989 = vst [vmem:[%s2018_s12 + $0xd8] sm:$0xff] %v939_v32  ;;  %v934_v33 = vadd.f32 %v2013_v22, %v933_v20 }
 0x246   : > { %v1374_v34 = vpop.f32.mrf.mxu1 }
 0x247   : > { %988 = vst [vmem:[%s2018_s12 + $0xd0] sm:$0xff] %v934_v33  ;;  %v949_v36 = vadd.f32 %v1374_v34, %v2013_v22 }
 0x248   : > { %v943_v37 = vpop.f32.mrf.mxu1 }
 0x249   : > { %991 = vst [vmem:[%s2018_s12 + $0xe8] sm:$0xff] %v949_v36  ;;  %v944_v7 = vadd.f32 %v2013_v22, %v943_v37 }
 0x24a   : > { %v1377_v39 = vpop.f32.mrf.mxu1 }
 0x24b   : > { %990 = vst [vmem:[%s2018_s12 + $0xe0] sm:$0xff] %v944_v7  ;;  %v959_v40 = vadd.f32 %v1377_v39, %v2013_v22 }
 0x24c   : > { %v953_v13 = vpop.f32.mrf.mxu1 }
 0x24d   : > { %993 = vst [vmem:[%s2018_s12 + $0xf8] sm:$0xff] %v959_v40  ;;  %v954_v41 = vadd.f32 %v2013_v22, %v953_v13 }
 0x24f   : > { %992 = vst [vmem:[%s2018_s12 + $0xf0] sm:$0xff] %v954_v41 }
 0x250   : > { %1606 = shalt.err (!%p1603_p3)
}
 0x251   : > { %s1607_s13 = scalar_lea.hbm %s2085_s11, 4096  ;;  %s1611_s9 = scalar_lea.hbm %s2138_s5, 8192 }
 0x252   : > { %p1608_p11 = scmp.ne.s32.totalorder %s2085_s11, %s1607_s13  ;;  %p1612_p4 = scmp.lt.s32.totalorder %s2085_s11, %s2138_s5 }
 0x253   : > { %p1613_p6 = scmp.lt.s32.totalorder %s1611_s9, %s1607_s13 }
 0x254   : > { %p1609_p9 = pnand %p1608_p11, %p2155_p2 }
 0x255   : > { %p1614_p8 = por %p1613_p6, %p1612_p4 }
 0x256   : > { %p1610_p1 = pneg %p1609_p9 }
 0x258   : > { %p1615_p5 = pnand %p1614_p8, %p1610_p1 }
 0x25a   : > { %1618 = shalt.err (!%p1615_p5)
}
 0x25b   : > { %s1669_s14 = smov 128   ;;  %s1670_s7 = smov 8  }
 0x25c   : > { %1388 = dma.vmem_to_hbm [thread:$0]  (%p2155_p2), %s2087_s6, 4096, %s2085_s11, %s995_s22, %s1669_s14, %s1669_s14, %s1670_s7  }
 0x25d PF: > { %s1023_s28 = sand.u32 1, %s1649_s18   ;;  %p2156_p7 = scmp.ne.s32.totalorder %s2145_s25, 0 }
 0x25e   : > { %p2157_p12 = scmp.ge.s32.totalorder %s1661_s21, 2  ;;  %s1024_s17 = scalar_lea.sflag [#allocation4], %s1023_s28 }
 0x260   : > { %p1402_p13 = pnand %p2157_p12, %p2156_p7 }
 0x262   : > { %p1403_p0 = pneg %p1402_p13 }
 0x264   : > { %1644 = dma.done.wait (%p1403_p0), %s1024_s17, 4096  }
 0x265   : > { %1646 = vsyncadd (%p1403_p0), %s1024_s17, 4294963200  ;;  %p19_p10 = scmp.ge.s32.totalorder %s1779_s15, 4   ;;  %s2158_s18 = smov %s1653_s19 }
 0x266   : > { %s2159_s19 = smov %s1657_s20  ;;  %s2160_s20 = smov %s1795_s27 }
 0x267   : > { %s2161_s21 = smov %s1779_s15  ;;  %21 = sbr.rel (!%p19_p10) target bundleno = 6 (0x6), region = 93 }
 0x26c   :  { %1029 = vsyncpa [#allocation3], 1 }
 0x26d   :  { %1031 = vsyncpa [#allocation3 + $0x1], 1 }
 0x26e   :  { %1032 = vsyncpa [#allocation6], 1 }
 0x26f   :  { %1033 = vsyncpa [#allocation4], 1 }
 0x270   :  { %1035 = vsyncpa [#allocation4 + $0x1], 1 }

</bundles_post_ra>
